<compile_context>
chip_gen: v5e
topology: v5e:2x2
jax: 0.10.0
libtpu: 0.0.40
codegen_flags: <defaults>
</compile_context>

<pallas_src>
import jax
import jax.numpy as jnp
from jax.experimental import pallas as pl
from jax.experimental.pallas import tpu as pltpu


def _round_up(x, m):
    return ((x + m - 1) // m) * m


def _mlp_kernel(x_ref,
                w0_ref, b0_ref,
                w1_ref, b1_ref,
                w2_ref, b2_ref,
                w3_ref, b3_ref,
                w4_ref, b4_ref,
                o_ref):
    """Fused 5-layer MLP on one batch tile (all weights resident in VMEM).

    Matmuls run on the MXU with bf16 operands and f32 accumulation; bias adds
    and ReLU are done in f32, and activations are cast back to the compute
    dtype before the next matmul.
    """
    cdt = w0_ref.dtype                                   # matmul operand dtype
    h = jnp.dot(x_ref[...], w0_ref[...], preferred_element_type=jnp.float32)
    h = jnp.maximum(h + b0_ref[...], 0.0).astype(cdt)    # input + relu_1
    h = jnp.dot(h, w1_ref[...], preferred_element_type=jnp.float32)
    h = jnp.maximum(h + b1_ref[...], 0.0).astype(cdt)    # hidden_1 + relu_2
    h = jnp.dot(h, w2_ref[...], preferred_element_type=jnp.float32)
    h = jnp.maximum(h + b2_ref[...], 0.0).astype(cdt)    # hidden_2 + relu_3
    h = jnp.dot(h, w3_ref[...], preferred_element_type=jnp.float32)
    h = jnp.maximum(h + b3_ref[...], 0.0).astype(cdt)    # hidden_3 + relu_4
    y = jnp.dot(h, w4_ref[...], preferred_element_type=jnp.float32)
    o_ref[...] = (y + b4_ref[...]).astype(o_ref.dtype)   # output (lane-padded)


def digit_recognizer_forward(x, params, *, batch_tile=512,
                             compute_dtype=jnp.bfloat16):
    """x: [B, input_size] float32.  params: list of (W, b) with W [in, out].

    Computes relu(...relu(x @ W0 + b0)...) @ W4 + b4 (no relu on the output),
    matching the PyTorch digitRecognizer forward.
    """
    B, F = x.shape
    H = params[0][0].shape[1]
    C = params[-1][0].shape[1]

    Fp = _round_up(F, 128)            # lane-pad input features
    Cp = _round_up(C, 128)            # lane-dense output width

    # --- choose the batch tile (multiple of 8, grid >= 2 when possible) ----
    bt = _round_up(min(batch_tile, _round_up(B, 8)), 8)
    if _round_up(B, bt) // bt < 2 and bt >= 16:
        # Split so the "parallel" batch axis gives both v7x TensorCores work.
        bt = _round_up(pl.cdiv(B, 2), 8)
    Bp = _round_up(B, bt)

    # --- pad + cast inputs / parameters ------------------------------------
    xp = jnp.zeros((Bp, Fp), compute_dtype).at[:B, :F].set(
        x.astype(compute_dtype))

    in_specs = [pl.BlockSpec((bt, Fp), lambda i: (i, 0))]
    full_spec = lambda shape: pl.BlockSpec(shape, lambda i: (0, 0))
    flat_params = []
    n_layers = len(params)
    for li, (w, b) in enumerate(params):
        fin, fout = w.shape
        fin_p = Fp if li == 0 else fin
        fout_p = Cp if li == n_layers - 1 else fout
        wp = jnp.zeros((fin_p, fout_p), compute_dtype).at[:fin, :fout].set(
            w.astype(compute_dtype))
        bp = jnp.zeros((1, fout_p), jnp.float32).at[0, :fout].set(
            b.astype(jnp.float32))
        # Weights/biases have a constant index_map and are tiny (<1 MiB total),
        # so the default pipeline buffering overhead is negligible.
        in_specs.append(full_spec(wp.shape))
        in_specs.append(full_spec(bp.shape))
        flat_params += [wp, bp]

    flops = 2 * Bp * (Fp * H + 3 * H * H + H * Cp)
    bytes_accessed = (xp.size * xp.dtype.itemsize
                      + sum(p.size * p.dtype.itemsize for p in flat_params)
                      + Bp * Cp * 4)

    out = pl.pallas_call(
        _mlp_kernel,
        out_shape=jax.ShapeDtypeStruct((Bp, Cp), jnp.float32),
        grid_spec=pltpu.PrefetchScalarGridSpec(
            num_scalar_prefetch=0,
            grid=(Bp // bt,),
            in_specs=in_specs,
            out_specs=pl.BlockSpec((bt, Cp), lambda i: (i, 0)),
        ),
        compiler_params=pltpu.CompilerParams(
            dimension_semantics=("parallel",)),
        cost_estimate=pl.CostEstimate(flops=flops, transcendentals=0,
                                      bytes_accessed=bytes_accessed),
    )(xp, *flat_params)

    return out[:B, :C]


def init_params(key, input_size, hidden_layers, num_classes):
    """Deterministic synthetic init (uniform like PyTorch's default Linear)."""
    dims = [(input_size, hidden_layers),
            (hidden_layers, hidden_layers),
            (hidden_layers, hidden_layers),
            (hidden_layers, hidden_layers),
            (hidden_layers, num_classes)]
    params = []
    for fan_in, fan_out in dims:
        key, kw, kb = jax.random.split(key, 3)
        bound = 1.0 / (fan_in ** 0.5)
        w = jax.random.uniform(kw, (fan_in, fan_out), jnp.float32, -bound, bound)
        b = jax.random.uniform(kb, (fan_out,), jnp.float32, -bound, bound)
        params.append((w, b))
    return params


def _reference(x, params, compute_dtype=jnp.bfloat16):
    """Pure-JAX reference replicating the kernel math (bf16 ops, f32 acc)."""
    h = x.astype(compute_dtype)
    for i, (w, b) in enumerate(params):
        y = jnp.dot(h, w.astype(compute_dtype),
                    preferred_element_type=jnp.float32) + b.astype(jnp.float32)
        if i < len(params) - 1:
            h = jnp.maximum(y, 0.0).astype(compute_dtype)
        else:
            h = y
    return h


if __name__ == "__main__":
    # MNIST-like digit recognizer: flattened 28x28 images, 10 classes.
    batch, input_size, hidden, num_classes = 50, 784, 128, 10

    key = jax.random.PRNGKey(0)
    key, kx = jax.random.split(key)
    x = jax.random.normal(kx, (batch, input_size), jnp.float32)
    params = init_params(key, input_size, hidden, num_classes)

    out = digit_recognizer_forward(x, params)
    out = jax.block_until_ready(out)

    ref = _reference(x, params)
    assert out.shape == (batch, num_classes)
    assert jnp.allclose(out, ref, atol=1e-2, rtol=1e-2), \
        float(jnp.max(jnp.abs(out - ref)))
    print("KERNEL_OK")
</pallas_src>

<mosaic_0001>
module attributes {stable_mosaic.version = 11 : i64} {
  func.func @_mlp_kernel(%arg0: i32, %arg1: memref<32x896xbf16, #tpu.memory_space<vmem>>, %arg2: memref<896x128xbf16, #tpu.memory_space<vmem>>, %arg3: memref<1x128xf32, #tpu.memory_space<vmem>>, %arg4: memref<128x128xbf16, #tpu.memory_space<vmem>>, %arg5: memref<1x128xf32, #tpu.memory_space<vmem>>, %arg6: memref<128x128xbf16, #tpu.memory_space<vmem>>, %arg7: memref<1x128xf32, #tpu.memory_space<vmem>>, %arg8: memref<128x128xbf16, #tpu.memory_space<vmem>>, %arg9: memref<1x128xf32, #tpu.memory_space<vmem>>, %arg10: memref<128x128xbf16, #tpu.memory_space<vmem>>, %arg11: memref<1x128xf32, #tpu.memory_space<vmem>>, %arg12: memref<32x128xf32, #tpu.memory_space<vmem>>) attributes {dimension_semantics = [#tpu.dimension_semantics<parallel>], iteration_bounds = array<i64: 2>, scalar_prefetch = 0 : i64, scratch_operands = 0 : i64, tpu.core_type = #tpu.core_type<tc>, window_params = [{transform_indices = @transform_0, window_bounds = array<i64: 32, 896>}, {pipeline_mode = #tpu.pipeline_mode<synchronous>, transform_indices = @transform_1, window_bounds = array<i64: 896, 128>}, {pipeline_mode = #tpu.pipeline_mode<synchronous>, transform_indices = @transform_2, window_bounds = array<i64: 1, 128>}, {pipeline_mode = #tpu.pipeline_mode<synchronous>, transform_indices = @transform_3, window_bounds = array<i64: 128, 128>}, {pipeline_mode = #tpu.pipeline_mode<synchronous>, transform_indices = @transform_4, window_bounds = array<i64: 1, 128>}, {pipeline_mode = #tpu.pipeline_mode<synchronous>, transform_indices = @transform_5, window_bounds = array<i64: 128, 128>}, {pipeline_mode = #tpu.pipeline_mode<synchronous>, transform_indices = @transform_6, window_bounds = array<i64: 1, 128>}, {pipeline_mode = #tpu.pipeline_mode<synchronous>, transform_indices = @transform_7, window_bounds = array<i64: 128, 128>}, {pipeline_mode = #tpu.pipeline_mode<synchronous>, transform_indices = @transform_8, window_bounds = array<i64: 1, 128>}, {pipeline_mode = #tpu.pipeline_mode<synchronous>, transform_indices = @transform_9, window_bounds = array<i64: 128, 128>}, {pipeline_mode = #tpu.pipeline_mode<synchronous>, transform_indices = @transform_10, window_bounds = array<i64: 1, 128>}, {transform_indices = @transform_11, window_bounds = array<i64: 32, 128>}]} {
    %c0 = arith.constant 0 : index
    %c0_0 = arith.constant 0 : index
    %0 = vector.load %arg1[%c0, %c0_0] : memref<32x896xbf16, #tpu.memory_space<vmem>>, vector<32x896xbf16>
    %c0_1 = arith.constant 0 : index
    %c0_2 = arith.constant 0 : index
    %1 = vector.load %arg2[%c0_1, %c0_2] : memref<896x128xbf16, #tpu.memory_space<vmem>>, vector<896x128xbf16>
    %cst = arith.constant dense<0.000000e+00> : vector<32x128xf32>
    %2 = tpu.matmul %0, %1, %cst {dimension_numbers = #tpu.dot_dimension_numbers<[1], [0], [0], [1], [0, 0, 1, 1], [], []>} : vector<32x896xbf16>, vector<896x128xbf16>, vector<32x128xf32> -> vector<32x128xf32>
    %c0_3 = arith.constant 0 : index
    %c0_4 = arith.constant 0 : index
    %3 = vector.load %arg3[%c0_3, %c0_4] : memref<1x128xf32, #tpu.memory_space<vmem>>, vector<1x128xf32>
    %4 = vector.broadcast %3 : vector<1x128xf32> to vector<32x128xf32>
    %5 = arith.addf %2, %4 : vector<32x128xf32>
    %cst_5 = arith.constant 0.000000e+00 : f32
    %6 = vector.broadcast %cst_5 : f32 to vector<32x128xf32>
    %7 = arith.maximumf %5, %6 : vector<32x128xf32>
    %8 = arith.truncf %7 : vector<32x128xf32> to vector<32x128xbf16>
    %c0_6 = arith.constant 0 : index
    %c0_7 = arith.constant 0 : index
    %9 = vector.load %arg4[%c0_6, %c0_7] : memref<128x128xbf16, #tpu.memory_space<vmem>>, vector<128x128xbf16>
    %cst_8 = arith.constant dense<0.000000e+00> : vector<32x128xf32>
    %10 = tpu.matmul %8, %9, %cst_8 {dimension_numbers = #tpu.dot_dimension_numbers<[1], [0], [0], [1], [0, 0, 1, 1], [], []>} : vector<32x128xbf16>, vector<128x128xbf16>, vector<32x128xf32> -> vector<32x128xf32>
    %c0_9 = arith.constant 0 : index
    %c0_10 = arith.constant 0 : index
    %11 = vector.load %arg5[%c0_9, %c0_10] : memref<1x128xf32, #tpu.memory_space<vmem>>, vector<1x128xf32>
    %12 = vector.broadcast %11 : vector<1x128xf32> to vector<32x128xf32>
    %13 = arith.addf %10, %12 : vector<32x128xf32>
    %cst_11 = arith.constant 0.000000e+00 : f32
    %14 = vector.broadcast %cst_11 : f32 to vector<32x128xf32>
    %15 = arith.maximumf %13, %14 : vector<32x128xf32>
    %16 = arith.truncf %15 : vector<32x128xf32> to vector<32x128xbf16>
    %c0_12 = arith.constant 0 : index
    %c0_13 = arith.constant 0 : index
    %17 = vector.load %arg6[%c0_12, %c0_13] : memref<128x128xbf16, #tpu.memory_space<vmem>>, vector<128x128xbf16>
    %cst_14 = arith.constant dense<0.000000e+00> : vector<32x128xf32>
    %18 = tpu.matmul %16, %17, %cst_14 {dimension_numbers = #tpu.dot_dimension_numbers<[1], [0], [0], [1], [0, 0, 1, 1], [], []>} : vector<32x128xbf16>, vector<128x128xbf16>, vector<32x128xf32> -> vector<32x128xf32>
    %c0_15 = arith.constant 0 : index
    %c0_16 = arith.constant 0 : index
    %19 = vector.load %arg7[%c0_15, %c0_16] : memref<1x128xf32, #tpu.memory_space<vmem>>, vector<1x128xf32>
    %20 = vector.broadcast %19 : vector<1x128xf32> to vector<32x128xf32>
    %21 = arith.addf %18, %20 : vector<32x128xf32>
    %cst_17 = arith.constant 0.000000e+00 : f32
    %22 = vector.broadcast %cst_17 : f32 to vector<32x128xf32>
    %23 = arith.maximumf %21, %22 : vector<32x128xf32>
    %24 = arith.truncf %23 : vector<32x128xf32> to vector<32x128xbf16>
    %c0_18 = arith.constant 0 : index
    %c0_19 = arith.constant 0 : index
    %25 = vector.load %arg8[%c0_18, %c0_19] : memref<128x128xbf16, #tpu.memory_space<vmem>>, vector<128x128xbf16>
    %cst_20 = arith.constant dense<0.000000e+00> : vector<32x128xf32>
    %26 = tpu.matmul %24, %25, %cst_20 {dimension_numbers = #tpu.dot_dimension_numbers<[1], [0], [0], [1], [0, 0, 1, 1], [], []>} : vector<32x128xbf16>, vector<128x128xbf16>, vector<32x128xf32> -> vector<32x128xf32>
    %c0_21 = arith.constant 0 : index
    %c0_22 = arith.constant 0 : index
    %27 = vector.load %arg9[%c0_21, %c0_22] : memref<1x128xf32, #tpu.memory_space<vmem>>, vector<1x128xf32>
    %28 = vector.broadcast %27 : vector<1x128xf32> to vector<32x128xf32>
    %29 = arith.addf %26, %28 : vector<32x128xf32>
    %cst_23 = arith.constant 0.000000e+00 : f32
    %30 = vector.broadcast %cst_23 : f32 to vector<32x128xf32>
    %31 = arith.maximumf %29, %30 : vector<32x128xf32>
    %32 = arith.truncf %31 : vector<32x128xf32> to vector<32x128xbf16>
    %c0_24 = arith.constant 0 : index
    %c0_25 = arith.constant 0 : index
    %33 = vector.load %arg10[%c0_24, %c0_25] : memref<128x128xbf16, #tpu.memory_space<vmem>>, vector<128x128xbf16>
    %cst_26 = arith.constant dense<0.000000e+00> : vector<32x128xf32>
    %34 = tpu.matmul %32, %33, %cst_26 {dimension_numbers = #tpu.dot_dimension_numbers<[1], [0], [0], [1], [0, 0, 1, 1], [], []>} : vector<32x128xbf16>, vector<128x128xbf16>, vector<32x128xf32> -> vector<32x128xf32>
    %c0_27 = arith.constant 0 : index
    %c0_28 = arith.constant 0 : index
    %35 = vector.load %arg11[%c0_27, %c0_28] : memref<1x128xf32, #tpu.memory_space<vmem>>, vector<1x128xf32>
    %36 = vector.broadcast %35 : vector<1x128xf32> to vector<32x128xf32>
    %37 = arith.addf %34, %36 : vector<32x128xf32>
    %c0_29 = arith.constant 0 : index
    %c0_30 = arith.constant 0 : index
    %38 = vector.load %arg12[%c0_29, %c0_30] : memref<32x128xf32, #tpu.memory_space<vmem>>, vector<32x128xf32>
    tpu.vector_store %arg12[%c0_29, %c0_30], %37 {strides = array<i32>} : memref<32x128xf32, #tpu.memory_space<vmem>>, vector<32x128xf32>,
    return
  }
  func.func @transform_0(%arg0: i32) -> (i32, i32) {
    %c0_i32 = arith.constant 0 : i32
    %c0_i32_0 = arith.constant 0 : i32
    return %arg0, %c0_i32 : i32, i32
  }
  func.func @transform_1(%arg0: i32) -> (i32, i32) {
    %c0_i32 = arith.constant 0 : i32
    %c0_i32_0 = arith.constant 0 : i32
    %c0_i32_1 = arith.constant 0 : i32
    return %c0_i32, %c0_i32_0 : i32, i32
  }
  func.func @transform_2(%arg0: i32) -> (i32, i32) {
    %c0_i32 = arith.constant 0 : i32
    %c0_i32_0 = arith.constant 0 : i32
    %c0_i32_1 = arith.constant 0 : i32
    return %c0_i32, %c0_i32_0 : i32, i32
  }
  func.func @transform_3(%arg0: i32) -> (i32, i32) {
    %c0_i32 = arith.constant 0 : i32
    %c0_i32_0 = arith.constant 0 : i32
    %c0_i32_1 = arith.constant 0 : i32
    return %c0_i32, %c0_i32_0 : i32, i32
  }
  func.func @transform_4(%arg0: i32) -> (i32, i32) {
    %c0_i32 = arith.constant 0 : i32
    %c0_i32_0 = arith.constant 0 : i32
    %c0_i32_1 = arith.constant 0 : i32
    return %c0_i32, %c0_i32_0 : i32, i32
  }
  func.func @transform_5(%arg0: i32) -> (i32, i32) {
    %c0_i32 = arith.constant 0 : i32
    %c0_i32_0 = arith.constant 0 : i32
    %c0_i32_1 = arith.constant 0 : i32
    return %c0_i32, %c0_i32_0 : i32, i32
  }
  func.func @transform_6(%arg0: i32) -> (i32, i32) {
    %c0_i32 = arith.constant 0 : i32
    %c0_i32_0 = arith.constant 0 : i32
    %c0_i32_1 = arith.constant 0 : i32
    return %c0_i32, %c0_i32_0 : i32, i32
  }
  func.func @transform_7(%arg0: i32) -> (i32, i32) {
    %c0_i32 = arith.constant 0 : i32
    %c0_i32_0 = arith.constant 0 : i32
    %c0_i32_1 = arith.constant 0 : i32
    return %c0_i32, %c0_i32_0 : i32, i32
  }
  func.func @transform_8(%arg0: i32) -> (i32, i32) {
    %c0_i32 = arith.constant 0 : i32
    %c0_i32_0 = arith.constant 0 : i32
    %c0_i32_1 = arith.constant 0 : i32
    return %c0_i32, %c0_i32_0 : i32, i32
  }
  func.func @transform_9(%arg0: i32) -> (i32, i32) {
    %c0_i32 = arith.constant 0 : i32
    %c0_i32_0 = arith.constant 0 : i32
    %c0_i32_1 = arith.constant 0 : i32
    return %c0_i32, %c0_i32_0 : i32, i32
  }
  func.func @transform_10(%arg0: i32) -> (i32, i32) {
    %c0_i32 = arith.constant 0 : i32
    %c0_i32_0 = arith.constant 0 : i32
    %c0_i32_1 = arith.constant 0 : i32
    return %c0_i32, %c0_i32_0 : i32, i32
  }
  func.func @transform_11(%arg0: i32) -> (i32, i32) {
    %c0_i32 = arith.constant 0 : i32
    %c0_i32_0 = arith.constant 0 : i32
    return %arg0, %c0_i32 : i32, i32
  }
}

</mosaic_0001>

<bundles_post_ra>
// kernel: tpu_custom_call.1
= control target key start
LH: loop header
LB: loop body
LE: loop exit
PB: predicated region body
PF: predicated region fallthrough
CT: control target
= control target key end

     0   :  { %s2879_s0 = inlined_call_operand.hbm [shape: bf16[64,896], index: 0, kind: input, shape index: {}]   ;;  %s2880_s1 = inlined_call_operand.hbm [shape: bf16[896,128], index: 1, kind: input, shape index: {}]   ;;  %s2881_s2 = inlined_call_operand.vmem [shape: f32[1,128], index: 2, kind: input, shape index: {}]   ;;  %s2882_s3 = inlined_call_operand.hbm [shape: bf16[128,128], index: 3, kind: input, shape index: {}]   ;;  %s2883_s4 = inlined_call_operand.vmem [shape: f32[1,128], index: 4, kind: input, shape index: {}]   ;;  %s2884_s5 = inlined_call_operand.hbm [shape: bf16[128,128], index: 5, kind: input, shape index: {}]   ;;  %s2885_s6 = inlined_call_operand.vmem [shape: f32[1,128], index: 6, kind: input, shape index: {}]   ;;  %s2886_s7 = inlined_call_operand.hbm [shape: bf16[128,128], index: 7, kind: input, shape index: {}]   ;;  %s2887_s8 = inlined_call_operand.vmem [shape: f32[1,128], index: 8, kind: input, shape index: {}]   ;;  %s2888_s9 = inlined_call_operand.hbm [shape: bf16[128,128], index: 9, kind: input, shape index: {}]   ;;  %s2889_s10 = inlined_call_operand.vmem [shape: f32[1,128], index: 10, kind: input, shape index: {}]   ;;  %s2890_s11 = inlined_call_operand.hbm [shape: f32[64,128], index: 11, kind: output, shape index: {}]  }
   0x1   :  { %2894 = sst [smem:[#allocation22_spill]] %s2880_s1 }
   0x2   :  { %2895 = sst [smem:[#allocation23_spill]] %s2882_s3 }
   0x3   :  { %2896 = sst [smem:[#allocation24_spill]] %s2884_s5 }
   0x4   :  { %2897 = sst [smem:[#allocation25_spill]] %s2886_s7 }
   0x5   :  { %2898 = sst [smem:[#allocation26_spill]] %s2888_s9 }
   0x6   :  { %16 = vsyncpa [#allocation3], 0 }
   0x7   :  { %18 = vsyncpa [#allocation3 + $0x1], 0 }
   0x8   :  { %19 = vsyncpa [#allocation6], 0 }
   0x9   :  { %20 = vsyncpa [#allocation9], 0 }
   0xa   :  { %21 = vsyncpa [#allocation12], 0 }
   0xb   :  { %22 = vsyncpa [#allocation4], 0 }
   0xc   :  { %24 = vsyncpa [#allocation4 + $0x1], 0  ;;  %s2663_s17 = smov 0   ;;  %s2665_s18 = smov 0  }
   0xd   :  { %s2667_s19 = smov 0   ;;  %s2669_s20 = smov 0  }
   0xe LB: > { %2899 = sst [smem:[#allocation19_spill]] %s2586_s19  ;;  %s2687_s24 = sadd.s32 4294967295, %s2590_s20   ;;  %s2590_s20 = sphi %s2669_s20, %s2914_s20   ;;  %s2586_s19 = sphi %s2667_s19, %s2916_s19   ;;  %s2582_s18 = sphi %s2665_s18, %s2918_s18   ;;  %s2578_s17 = sphi %s2663_s17, %s2917_s17  }
   0xf   : > { %s2900_s1 = sld [smem:[#allocation22_spill]]  ;;  %p1680_p0 = scmp.ge.s32.totalorder %s2590_s20, 1 }
  0x10   : > { %p51_p1 = scmp.eq.s32.totalorder %s2687_s24, 0  ;;  %p297_p2 = scmp.lt.s32.totalorder %s2590_s20, 3 }
  0x11   : > { %s2592_s26 = smov [#allocation5]   ;;  %s2902_s5 = sld [smem:[#allocation24_spill]] }
  0x12   : > { %p2692_p3 = pnand %p1680_p0, %p297_p2  ;;  %s310_s27 = sshll.u32 %s2592_s26, 4  ;;  %s311_s27 = int_to_ptr.vmem [resolvable:$true] %s310_s27 }
  0x13   : > { %s2904_s3 = sld [smem:[#allocation23_spill]]  ;;  %s2593_s16 = smov [#allocation8]  }
  0x14   : > { %p2248_p4 = pneg %p2692_p3  ;;  %s344_s21 = sshll.u32 %s2593_s16, 4  ;;  %s345_s21 = int_to_ptr.vmem [resolvable:$true] %s344_s21 }
  0x15   : > { %s308_s23 = sshll.u32 %s2900_s1, 4  ;;  %s2594_s22 = smov 64   ;;  %s309_s23 = int_to_ptr.hbm [resolvable:$true] %s308_s23 }
  0x16   : > { %p2704_p6 = pnand %p2248_p4, %p51_p1  ;;  %s2595_s26 = smov 4  }
  0x17   : > { %s342_s30 = sshll.u32 %s2902_s5, 4  ;;  %s2905_s7 = sld [smem:[#allocation25_spill]]  ;;  %s343_s30 = int_to_ptr.hbm [resolvable:$true] %s342_s30 }
  0x18   : > { %2251 = dma.hbm_to_vmem [thread:$0]  (!%p2704_p6), %s309_s23, 7168, %s311_s27, [#allocation6], %s2594_s22, %s2594_s22, %s2595_s26  }
  0x19   : > { %s325_s15 = sshll.u32 %s2904_s3, 4  ;;  %s2596_s5 = smov [#allocation7]   ;;  %s326_s15 = int_to_ptr.hbm [resolvable:$true] %s325_s15 }
  0x1a   : > { %2257 = dma.hbm_to_vmem [thread:$0]  (!%p2704_p6), %s343_s30, 1024, %s345_s21, [#allocation9], %s2594_s22, %s2594_s22, %s2595_s26  }
  0x1b   : > { %s327_s13 = sshll.u32 %s2596_s5, 4  ;;  %s2597_s23 = smov [#allocation10]   ;;  %s328_s13 = int_to_ptr.vmem [resolvable:$true] %s327_s13 }
  0x1c   : > { %2254 = dma.hbm_to_vmem [thread:$0]  (!%p2704_p6), %s326_s15, 1024, %s328_s13, [#allocation6], %s2594_s22, %s2594_s22, %s2595_s26  }
  0x1d   : > { %s359_s1 = sshll.u32 %s2905_s7, 4  ;;  %s361_s27 = sshll.u32 %s2597_s23, 4  ;;  %s360_s1 = int_to_ptr.hbm [resolvable:$true] %s359_s1  ;;  %s362_s27 = int_to_ptr.vmem [resolvable:$true] %s361_s27 }
  0x1e   : > { %s2906_s9 = sld [smem:[#allocation26_spill]]  ;;  %s2598_s5 = smov [#allocation11]  }
  0x1f   : > { %2260 = dma.hbm_to_vmem [thread:$0]  (!%p2704_p6), %s360_s1, 1024, %s362_s27, [#allocation9], %s2594_s22, %s2594_s22, %s2595_s26  }
  0x20   : > { %s378_s21 = sshll.u32 %s2598_s5, 4  ;;  %s1679_s15 = sadd.s32 4294967294, %s2590_s20   ;;  %s379_s21 = int_to_ptr.vmem [resolvable:$true] %s378_s21 }
  0x21   : > { %s2729_s28 = sadd.s32 1, %s2590_s20   ;;  %s37_s29 = sadd.s32 1, %s2586_s19 }
  0x22   : > { %2907 = sst [smem:[#allocation20_spill]] %s2729_s28  ;;  %s34_s13 = ssub.s32 %s2590_s20, %s2729_s28 }
  0x23   : > { %p44_p7 = scmp.ne.s32.totalorder %s2586_s19, %s2582_s18  ;;  %p35_p8 = scmp.eq.s32.totalorder %s34_s13, 0 }
  0x24   : > { %s376_s16 = sshll.u32 %s2906_s9, 4  ;;  %p45_p9 = scmp.eq.s32.totalorder %s2590_s20, 0  ;;  %s377_s16 = int_to_ptr.hbm [resolvable:$true] %s376_s16 }
  0x25   : > { %2263 = dma.hbm_to_vmem [thread:$0]  (!%p2704_p6), %s377_s16, 1024, %s379_s21, [#allocation12], %s2594_s22, %s2594_s22, %s2595_s26  }
  0x26   : > { %p50_p10 = scmp.ne.s32.totalorder %s2582_s18, %s2578_s17  ;;  %p284_p11 = scmp.eq.s32.totalorder %s2687_s24, 1 }
  0x27   : > { %s2741_s1 = scalar_select %p35_p8, %s2586_s19, %s37_s29  }
  0x28   : > { %p46_p12 = por %p45_p9, %p44_p7  ;;  %p2745_p13 = por %p51_p1, %p50_p10 }
  0x29   : > { %2908 = sst [smem:[#allocation21_spill]] %s2741_s1  ;;  %p2749_p0 = por %p284_p11, %p44_p7 }
  0x2a   : > { %p290_p2 = scmp.eq.s32.totalorder %s1679_s15, 1  ;;  %p2277_p4 = scmp.lt.s32.totalorder %s2590_s20, 2 }
  0x2b   : > { %s395_s26 = sand.u32 1, %s2586_s19   ;;  %s2222_s14 = smul.u32 112, %s2590_s20 }
  0x2c   : > { %p2755_p6 = por %p290_p2, %p50_p10  ;;  %s2221_s27 = smul.u32 112, %s395_s26 }
  0x2d   : > { %p2759_p8 = pnand %p2277_p4, %p46_p12  ;;  %s405_s21 = scalar_lea.hbm %s2879_s0, %s2222_s14 }
  0x2e   : > { %s399_s29 = scalar_lea.vmem [#allocation2], %s2221_s27  ;;  %s406_s15 = sshll.u32 %s405_s21, 4  ;;  %s407_s15 = int_to_ptr.hbm [resolvable:$true] %s406_s15 }
  0x2f   : > { %s408_s13 = sshll.u32 %s399_s29, 4  ;;  %s396_s3 = scalar_lea.sflag [#allocation3], %s395_s26  ;;  %s409_s13 = int_to_ptr.vmem [resolvable:$true] %s408_s13 }
  0x30   : > { %s2482_s7 = sshra.s32 %s407_s15, 4  ;;  %p2486_p9 = pneg %p2759_p8  ;;  %s2483_s7 = int_to_ptr.hbm [resolvable:$true] %s2482_s7 }
  0x31   : > { %s2484_s9 = scalar_lea.hbm %s2483_s7, 112  ;;  %s2489_s28 = scalar_lea.hbm %s2879_s0, 224 }
  0x32   : > { %p2485_p7 = scmp.ne.s32.totalorder %s2483_s7, %s2484_s9  ;;  %p2490_p12 = scmp.lt.s32.totalorder %s2483_s7, %s2879_s0 }
  0x33   : > { %p2491_p2 = scmp.lt.s32.totalorder %s2489_s28, %s2484_s9 }
  0x34   : > { %p2487_p10 = pnand %p2486_p9, %p2485_p7 }
  0x35   : > { %p2492_p4 = por %p2491_p2, %p2490_p12 }
  0x36   : > { %p2488_p11 = pneg %p2487_p10 }
  0x38   : > { %p2493_p5 = pnand %p2492_p4, %p2488_p11 }
  0x3a   : > { %2496 = shalt.err (!%p2493_p5)
}
  0x3b   : > { %s2599_s26 = smov 448   ;;  %s2600_s27 = smov 28  }
  0x3c   : > { %2267 = dma.hbm_to_vmem [thread:$0]  (!%p2759_p8), %s407_s15, 1792, %s409_s13, %s396_s3, %s2599_s26, %s2599_s26, %s2600_s27  }
  0x3d   : > { %420 = sbr.rel (%p2692_p3) target bundleno = 879 (0x36f), region = 64  ;;  %s2780_s19 = sand.u32 (!%p2692_p3), 1, %s2582_s18  }
  0x3e   : > { %s2223_s1 = smul.u32 (!%p2692_p3), 112, %s2780_s19  ;;  %s423_s7 = scalar_lea.sflag (!%p2692_p3), [#allocation3], %s2780_s19 }
  0x40   : > { %s2784_s9 = scalar_lea.vmem (!%p2692_p3), [#allocation2], %s2223_s1 }
  0x42   : > { %2557 = dma.done.wait (%p2745_p13), %s423_s7, 1792  }
  0x43   : > { %2559 = vsyncadd (%p2745_p13), %s423_s7, 4294965504 }
  0x44   : > { %2561 = dma.done.wait (%p51_p1), [#allocation6], 8192  }
  0x45   : > { %2563 = vsyncadd (%p51_p1), [#allocation6], 4294959104 }
  0x46   : > { %2565 = dma.done.wait (%p51_p1), [#allocation9], 2048  }
  0x47   : > { %2567 = vsyncadd (%p51_p1), [#allocation9], 4294965248 }
  0x48   : > { %2569 = dma.done.wait (%p51_p1), [#allocation12], 1024  }
  0x49   : > { %2571 = vsyncadd (%p51_p1), [#allocation12], 4294966272  ;;  %v2131_v0 = vld [vmem:[#allocation5 + $0x38] sm:$0xff]  ;;  %v2130_v4 = vld [vmem:[#allocation5 + $0x30] sm:$0xff]  ;;  %s1696_s13 = sshll.u32 %s2780_s19, 5  ;;  %s2212_s26 = sshll.u32 %s2687_s24, 5 }
  0x4a   : > { %v2139_v1 = vld [vmem:[#allocation5 + $0x78] sm:$0xff]  ;;  %1033 = vmatpush.bf16.msra.mxu0 %v2131_v0  ;;  %v2138_v5 = vld [vmem:[#allocation5 + $0x70] sm:$0xff]  ;;  %v2129_v8 = vld [vmem:[#allocation5 + $0x28] sm:$0xff]  ;;  %s490_s14 = scalar_lea.vmem [#allocation13], %s1696_s13  ;;  %s1554_s7 = scalar_lea.hbm %s2890_s11, %s2212_s26 }
  0x4b   : > { %v2147_v2 = vld [vmem:[#allocation5 + $0xb8] sm:$0xff]  ;;  %1052 = vmatpush.bf16.msra.mxu1 %v2139_v1  ;;  %v2146_v6 = vld [vmem:[#allocation5 + $0xb0] sm:$0xff]  ;;  %v2137_v9 = vld [vmem:[#allocation5 + $0x68] sm:$0xff]  ;;  %s1557_s3 = sshll.u32 %s1554_s7, 4  ;;  %s1543_s25 = scalar_lea.sflag [#allocation4], %s2780_s19  ;;  %s1558_s3 = int_to_ptr.hbm [resolvable:$true] %s1557_s3 }
  0x4c   : > { %v2155_v3 = vld [vmem:[#allocation5 + $0xf8] sm:$0xff]  ;;  %1071 = vmatpush.bf16.msra.mxu2 %v2147_v2  ;;  %v2154_v7 = vld [vmem:[#allocation5 + $0xf0] sm:$0xff]  ;;  %v2145_v10 = vld [vmem:[#allocation5 + $0xa8] sm:$0xff]  ;;  %s2526_s28 = sshra.s32 %s1558_s3, 4  ;;  %s2532_s5 = scalar_lea.hbm %s2890_s11, 64  ;;  %s2527_s28 = int_to_ptr.hbm [resolvable:$true] %s2526_s28 }
  0x4d   : > { %1090 = vmatpush.bf16.msra.mxu3 %v2155_v3  ;;  %v2153_v11 = vld [vmem:[#allocation5 + $0xe8] sm:$0xff]  ;;  %v2128_v12 = vld [vmem:[#allocation5 + $0x20] sm:$0xff]  ;;  %v2127_v16 = vld [vmem:[#allocation5 + $0x18] sm:$0xff]  ;;  %s2528_s12 = scalar_lea.hbm %s2527_s28, 32  ;;  %p2533_p13 = scmp.lt.s32.totalorder %s2527_s28, %s2890_s11 }
  0x4e   : > { %1034 = vmatpush.bf16.msra.mxu0 %v2130_v4  ;;  %v2136_v13 = vld [vmem:[#allocation5 + $0x60] sm:$0xff]  ;;  %v2135_v17 = vld [vmem:[#allocation5 + $0x58] sm:$0xff]  ;;  %v2126_v20 = vld [vmem:[#allocation5 + $0x10] sm:$0xff]  ;;  %p2529_p1 = scmp.ne.s32.totalorder %s2527_s28, %s2528_s12  ;;  %p2534_p8 = scmp.lt.s32.totalorder %s2532_s5, %s2528_s12 }
  0x4f   : > { %1053 = vmatpush.bf16.msra.mxu1 %v2138_v5  ;;  %v2144_v14 = vld [vmem:[#allocation5 + $0xa0] sm:$0xff]  ;;  %v2143_v18 = vld [vmem:[#allocation5 + $0x98] sm:$0xff]  ;;  %v2134_v21 = vld [vmem:[#allocation5 + $0x50] sm:$0xff] }
  0x50   : > { %1072 = vmatpush.bf16.msra.mxu2 %v2146_v6  ;;  %v2152_v15 = vld [vmem:[#allocation5 + $0xe0] sm:$0xff]  ;;  %v2151_v19 = vld [vmem:[#allocation5 + $0xd8] sm:$0xff]  ;;  %v2142_v22 = vld [vmem:[#allocation5 + $0x90] sm:$0xff]  ;;  %p2530_p3 = pnand %p2529_p1, %p2749_p0  ;;  %p2535_p7 = por %p2534_p8, %p2533_p13 }
  0x51   : > { %1091 = vmatpush.bf16.msra.mxu3 %v2154_v7  ;;  %v2150_v23 = vld [vmem:[#allocation5 + $0xd0] sm:$0xff]  ;;  %v2125_v24 = vld [vmem:[#allocation5 + $0x8] sm:$0xff]  ;;  %v2124_v28 = vld [vmem:[#allocation5] sm:$0xff] }
  0x52   : > { %1035 = vmatpush.bf16.msra.mxu0 %v2129_v8  ;;  %v2133_v25 = vld [vmem:[#allocation5 + $0x48] sm:$0xff]  ;;  %v2132_v29 = vld [vmem:[#allocation5 + $0x40] sm:$0xff]  ;;  %v2179_v38 = vld [vmem:[#allocation5 + $0x1b8] sm:$0xff]  ;;  %p2531_p5 = pneg %p2530_p3 }
  0x53   : > { %1054 = vmatpush.bf16.msra.mxu1 %v2137_v9  ;;  %v2141_v26 = vld [vmem:[#allocation5 + $0x88] sm:$0xff]  ;;  %v2140_v30 = vld [vmem:[#allocation5 + $0x80] sm:$0xff]  ;;  %v2163_v39 = vld [vmem:[#allocation5 + $0x138] sm:$0xff] }
  0x54   : > { %1073 = vmatpush.bf16.msra.mxu2 %v2145_v10  ;;  %v2149_v27 = vld [vmem:[#allocation5 + $0xc8] sm:$0xff]  ;;  %v2148_v31 = vld [vmem:[#allocation5 + $0xc0] sm:$0xff]  ;;  %v2171_v45 = vld [vmem:[#allocation5 + $0x178] sm:$0xff]  ;;  %p2536_p9 = pnand %p2535_p7, %p2531_p5 }
  0x55   : > { %1092 = vmatpush.bf16.msra.mxu3 %v2153_v11  ;;  %v1699_v32 = vld [vmem:[%s2784_s9] sm:$0xf]  ;;  %v2113_v33 = vld [vmem:[%s2784_s9 + $0x18] sm:$0xf0]  ;;  %v2110_v34 = vld [vmem:[%s2784_s9 + $0x4] sm:$0xf] }
  0x56   : > { %1036 = vmatpush.bf16.msra.mxu0 %v2128_v12  ;;  %v1701_v35 = vld [vmem:[%s2784_s9 + $0x1c] sm:$0xf0]  ;;  %v1707_v36 = vld [vmem:[%s2784_s9 + $0x8] sm:$0xf]  ;;  %v2114_v37 = vld [vmem:[%s2784_s9 + $0x20] sm:$0xf0]  ;;  %v1700_v42 = vor.u32 %v2113_v33, %v1699_v32 }
  0x57   : > { %1055 = vmatpush.bf16.msra.mxu1 %v2136_v13  ;;  %v2111_v40 = vld [vmem:[%s2784_s9 + $0xc] sm:$0xf]  ;;  %v1709_v41 = vld [vmem:[%s2784_s9 + $0x24] sm:$0xf0]  ;;  %v1704_v43 = vor.u32 %v2110_v34, %v1701_v35  ;;  %v1708_v44 = vor.u32 %v2114_v37, %v1707_v36  ;;  %v2178_v47 = vld [vmem:[#allocation5 + $0x1b0] sm:$0xff] }
  0x58   : > { %1074 = vmatpush.bf16.msra.mxu2 %v2144_v14  ;;  %v1712_v46 = vor.u32 %v2111_v40, %v1709_v41  ;;  %v2162_v48 = vld [vmem:[#allocation5 + $0x130] sm:$0xff]  ;;  %v2177_v50 = vld [vmem:[#allocation5 + $0x1a8] sm:$0xff]  ;;  %v2176_v53 = vld [vmem:[#allocation5 + $0x1a0] sm:$0xff] }
  0x59   : > { %1093 = vmatpush.bf16.msra.mxu3 %v2152_v15  ;;  %v2170_v49 = vld [vmem:[#allocation5 + $0x170] sm:$0xff]  ;;  %v2161_v51 = vld [vmem:[#allocation5 + $0x128] sm:$0xff]  ;;  %v2160_v54 = vld [vmem:[#allocation5 + $0x120] sm:$0xff] }
  0x5a   : > { %1037 = vmatpush.bf16.msra.mxu0 %v2127_v16  ;;  %v2169_v52 = vld [vmem:[#allocation5 + $0x168] sm:$0xff]  ;;  %v2168_v55 = vld [vmem:[#allocation5 + $0x160] sm:$0xff]  ;;  %v2175_v62 = vld [vmem:[#allocation5 + $0x198] sm:$0xff] }
  0x5b   : > { %1056 = vmatpush.bf16.msra.mxu1 %v2135_v17  ;;  %v1727_v56 = vld [vmem:[%s2784_s9 + $0x38] sm:$0xf]  ;;  %v2120_v57 = vld [vmem:[%s2784_s9 + $0x50] sm:$0xf0]  ;;  %v2117_v58 = vld [vmem:[%s2784_s9 + $0x3c] sm:$0xf] }
  0x5c   : > { %1075 = vmatpush.bf16.msra.mxu2 %v2143_v18  ;;  %v1729_v59 = vld [vmem:[%s2784_s9 + $0x54] sm:$0xf0]  ;;  %v1735_v60 = vld [vmem:[%s2784_s9 + $0x40] sm:$0xf]  ;;  %v2121_v61 = vld [vmem:[%s2784_s9 + $0x58] sm:$0xf0]  ;;  %v1728_v2 = vor.u32 %v2120_v57, %v1727_v56 }
  0x5d   : > { %1094 = vmatpush.bf16.msra.mxu3 %v2151_v19  ;;  %v2159_v63 = vld [vmem:[#allocation5 + $0x118] sm:$0xff]  ;;  %v2118_v0 = vld [vmem:[%s2784_s9 + $0x44] sm:$0xf]  ;;  %v1737_v1 = vld [vmem:[%s2784_s9 + $0x5c] sm:$0xf0]  ;;  %v1732_v3 = vor.u32 %v2117_v58, %v1729_v59  ;;  %v1736_v4 = vor.u32 %v2121_v61, %v1735_v60 }
  0x5e   : > { %1038 = vmatpush.bf16.msra.mxu0 %v2126_v20  ;;  %v2167_v5 = vld [vmem:[#allocation5 + $0x158] sm:$0xff]  ;;  %v1740_v6 = vor.u32 %v2118_v0, %v1737_v1  ;;  %v2174_v7 = vld [vmem:[#allocation5 + $0x190] sm:$0xff]  ;;  %v2173_v10 = vld [vmem:[#allocation5 + $0x188] sm:$0xff] }
  0x5f   : > { %1057 = vmatpush.bf16.msra.mxu1 %v2134_v21  ;;  %v2158_v8 = vld [vmem:[#allocation5 + $0x110] sm:$0xff]  ;;  %v2157_v11 = vld [vmem:[#allocation5 + $0x108] sm:$0xff]  ;;  %v2172_v13 = vld [vmem:[#allocation5 + $0x180] sm:$0xff] }
  0x60   : > { %1076 = vmatpush.bf16.msra.mxu2 %v2142_v22  ;;  %v2166_v9 = vld [vmem:[#allocation5 + $0x150] sm:$0xff]  ;;  %v2165_v12 = vld [vmem:[#allocation5 + $0x148] sm:$0xff]  ;;  %v2156_v14 = vld [vmem:[#allocation5 + $0x100] sm:$0xff] }
  0x61   : > { %1095 = vmatpush.bf16.msra.mxu3 %v2150_v23  ;;  %v2164_v15 = vld [vmem:[#allocation5 + $0x140] sm:$0xff]  ;;  %v2115_v17 = vld [vmem:[%s2784_s9 + $0x28] sm:$0xf0]  ;;  %v1723_v20 = vld [vmem:[%s2784_s9 + $0x18] sm:$0xf] }
  0x62   : > { %1039 = vmatpush.bf16.msra.mxu0 %v2125_v24  ;;  %v1715_v16 = vld [vmem:[%s2784_s9 + $0x10] sm:$0xf]  ;;  %v2112_v18 = vld [vmem:[%s2784_s9 + $0x14] sm:$0xf]  ;;  %v2187_v34 = vld [vmem:[#allocation7 + $0x38] sm:$0xff] }
  0x63   : > { %1058 = vmatpush.bf16.msra.mxu1 %v2133_v25  ;;  %v1717_v19 = vld [vmem:[%s2784_s9 + $0x2c] sm:$0xf0]  ;;  %v2116_v21 = vld [vmem:[%s2784_s9 + $0x30] sm:$0xf0]  ;;  %v1716_v22 = vor.u32 %v2115_v17, %v1715_v16  ;;  %v1743_v25 = vld [vmem:[%s2784_s9 + $0x48] sm:$0xf] }
  0x64   : > { %1077 = vmatpush.bf16.msra.mxu2 %v2141_v26  ;;  %v1720_v23 = vor.u32 %v2112_v18, %v1717_v19  ;;  %v1724_v24 = vor.u32 %v2116_v21, %v1723_v20  ;;  %v2122_v26 = vld [vmem:[%s2784_s9 + $0x60] sm:$0xf0]  ;;  %v2185_v36 = vld [vmem:[#allocation7 + $0x28] sm:$0xff]  ;;  %v2183_v40 = vld [vmem:[#allocation7 + $0x18] sm:$0xff] }
  0x65   : > { %1096 = vmatpush.bf16.msra.mxu3 %v2149_v27  ;;  %v2119_v27 = vld [vmem:[%s2784_s9 + $0x4c] sm:$0xf]  ;;  %v2186_v35 = vld [vmem:[#allocation7 + $0x30] sm:$0xff]  ;;  %v2192_v21 = vld [vmem:[#allocation8 + $0x20] sm:$0xff] }
  0x66   : > { %1040 = vmatpush.bf16.msra.mxu0 %v2124_v28  ;;  %v1745_v28 = vld [vmem:[%s2784_s9 + $0x64] sm:$0xf0] }
  0x67   : > { %1059 = vmatpush.bf16.msra.mxu1 %v2132_v29  ;;  %v1751_v29 = vld [vmem:[%s2784_s9 + $0x50] sm:$0xf]  ;;  %v1748_v32 = vor.u32 %v2119_v27, %v1745_v28 }
  0x68   : > { %1078 = vmatpush.bf16.msra.mxu2 %v2140_v30  ;;  %v2123_v30 = vld [vmem:[%s2784_s9 + $0x68] sm:$0xf0]  ;;  %s1555_s9 = sshll.u32 %s490_s14, 4  ;;  %s1556_s9 = int_to_ptr.vmem [resolvable:$true] %s1555_s9 }
  0x69   : > { %1097 = vmatpush.bf16.msra.mxu3 %v2148_v31  ;;  %1041 = vmatmul.bf16.vlgmr.msra.gmra.mxu0 %v1700_v42  ;;  %v1744_v31 = vor.u32 %v2122_v26, %v1743_v25  ;;  %v1752_v33 = vor.u32 %v2123_v30, %v1751_v29 }
  0x6a   : > { %1109 = vmatpush.bf16.msrb.mxu0 %v2163_v39  ;;  %1060 = vmatmul.bf16.vlgmr.msra.gmra.mxu1 %v1704_v43  ;;  %v2184_v39 = vld [vmem:[#allocation7 + $0x20] sm:$0xff] }
  0x6b   : > { %1079 = vmatmul.bf16.vlgmr.msra.gmra.mxu2 %v1708_v44  ;;  %1128 = vmatpush.bf16.msrb.mxu1 %v2171_v45  ;;  %v2182_v44 = vld [vmem:[#allocation7 + $0x10] sm:$0xff]  ;;  %v2181_v45 = vld [vmem:[#allocation7 + $0x8] sm:$0xff] }
  0x6c   : > { %1147 = vmatpush.bf16.msrb.mxu2 %v2179_v38  ;;  %1098 = vmatmul.bf16.vlgmr.msra.gmra.mxu3 %v1712_v46 }
  0x6d   : > { %1240 = vmatpush.bf16.msrb.mxu3 %v2187_v34 }
  0x6e   : > { %1110 = vmatpush.bf16.msrb.mxu0 %v2162_v48 }
  0x6f   : > { %1129 = vmatpush.bf16.msrb.mxu1 %v2170_v49  ;;  %v2180_v49 = vld [vmem:[#allocation7] sm:$0xff] }
  0x70   : > { %1148 = vmatpush.bf16.msrb.mxu2 %v2178_v47 }
  0x71   : > { %1241 = vmatpush.bf16.msrb.mxu3 %v2186_v35 }
  0x72   : > { %1111 = vmatpush.bf16.msrb.mxu0 %v2161_v51 }
  0x73   : > { %1130 = vmatpush.bf16.msrb.mxu1 %v2169_v52 }
  0x74   : > { %1149 = vmatpush.bf16.msrb.mxu2 %v2177_v50  ;;  %v2327_v50 = vld [vmem:[%s2881_s2] ss:$0 sm:$0xff] }
  0x75   : > { %1242 = vmatpush.bf16.msrb.mxu3 %v2185_v36 }
  0x76   : > { %1112 = vmatpush.bf16.msrb.mxu0 %v2160_v54 }
  0x77   : > { %1131 = vmatpush.bf16.msrb.mxu1 %v2168_v55 }
  0x78   : > { %1150 = vmatpush.bf16.msrb.mxu2 %v2176_v53 }
  0x79   : > { %1046 = vmatmul.bf16.gmra.mxu0 %v1728_v2  ;;  %1243 = vmatpush.bf16.msrb.mxu3 %v2184_v39  ;;  %v2195_v2 = vld [vmem:[#allocation8 + $0x38] sm:$0xff] }
  0x7a   : > { %1113 = vmatpush.bf16.msrb.mxu0 %v2159_v63  ;;  %1065 = vmatmul.bf16.gmra.mxu1 %v1732_v3 }
  0x7b   : > { %1084 = vmatmul.bf16.gmra.mxu2 %v1736_v4  ;;  %1132 = vmatpush.bf16.msrb.mxu1 %v2167_v5 }
  0x7c   : > { %1151 = vmatpush.bf16.msrb.mxu2 %v2175_v62  ;;  %1103 = vmatmul.bf16.gmra.mxu3 %v1740_v6 }
  0x7d   : > { %1244 = vmatpush.bf16.msrb.mxu3 %v2183_v40 }
  0x7e   : > { %1114 = vmatpush.bf16.msrb.mxu0 %v2158_v8 }
  0x7f   : > { %1133 = vmatpush.bf16.msrb.mxu1 %v2166_v9 }
  0x80   : > { %1152 = vmatpush.bf16.msrb.mxu2 %v2174_v7  ;;  %v2194_v7 = vld [vmem:[#allocation8 + $0x30] sm:$0xff] }
  0x81   : > { %1245 = vmatpush.bf16.msrb.mxu3 %v2182_v44 }
  0x82   : > { %1115 = vmatpush.bf16.msrb.mxu0 %v2157_v11 }
  0x83   : > { %1134 = vmatpush.bf16.msrb.mxu1 %v2165_v12 }
  0x84   : > { %1153 = vmatpush.bf16.msrb.mxu2 %v2173_v10 }
  0x85   : > { %1246 = vmatpush.bf16.msrb.mxu3 %v2181_v45  ;;  %v2191_v45 = vld [vmem:[#allocation8 + $0x18] sm:$0xff] }
  0x86   : > { %1116 = vmatpush.bf16.msrb.mxu0 %v2156_v14 }
  0x87   : > { %1135 = vmatpush.bf16.msrb.mxu1 %v2164_v15 }
  0x88   : > { %1154 = vmatpush.bf16.msrb.mxu2 %v2172_v13  ;;  %v2193_v13 = vld [vmem:[#allocation8 + $0x28] sm:$0xff] }
  0x89   : > { %1117 = vmatmul.bf16.vlgmr.msrb.gmra.mxu0 %v1716_v22  ;;  %1247 = vmatpush.bf16.msrb.mxu3 %v2180_v49  ;;  %v2203_v49 = vld [vmem:[#allocation10 + $0x38] sm:$0xff] }
  0x8a   : > { %1136 = vmatmul.bf16.vlgmr.msrb.gmra.mxu1 %v1720_v23  ;;  %1333 = vmatpush.bf16.msra.mxu0 %v2195_v2 }
  0x8b   : > { %1155 = vmatmul.bf16.vlgmr.msrb.gmra.mxu2 %v1724_v24  ;;  %1426 = vmatpush.bf16.msra.mxu1 %v2203_v49 }
  0x8d   : > { %2213 = vmatpush.bf16.msra.mxu3 %v2195_v2 }
  0x8e   : > { %1334 = vmatpush.bf16.msra.mxu0 %v2194_v7 }
  0x91   : > { %2214 = vmatpush.bf16.msra.mxu3 %v2194_v7  ;;  %v2196_v7 = vld [vmem:[#allocation10] sm:$0xff] }
  0x92   : > { %1335 = vmatpush.bf16.msra.mxu0 %v2193_v13 }
  0x95   : > { %2215 = vmatpush.bf16.msra.mxu3 %v2193_v13 }
  0x96   : > { %1336 = vmatpush.bf16.msra.mxu0 %v2192_v21 }
  0x99   : > { %1122 = vmatmul.bf16.gmra.mxu0 %v1744_v31  ;;  %2216 = vmatpush.bf16.msra.mxu3 %v2192_v21 }
  0x9a   : > { %1141 = vmatmul.bf16.gmra.mxu1 %v1748_v32  ;;  %1337 = vmatpush.bf16.msra.mxu0 %v2191_v45 }
  0x9b   : > { %1160 = vmatmul.bf16.gmra.mxu2 %v1752_v33 }
  0x9d   : > { %2217 = vmatpush.bf16.msra.mxu3 %v2191_v45 }
  0xe6   : > { %v1042_v37 = vpop.f32.mrf.mxu0 }
  0xe7   : > { %v1061_v38 = vpop.f32.mrf.mxu1  ;;  %v1043_v55 = vadd.f32 %v2327_v50, %v1042_v37 }
  0xe9   : > { %v1062_v56 = vadd.f32 %v1061_v38, %v1043_v55 }
  0xee   : > { %v1080_v41 = vpop.f32.mrf.mxu2  ;;  %v1044_v42 = vpop.f32.mrf.mxu0 }
  0xef   : > { %v1063_v43 = vpop.f32.mrf.mxu1  ;;  %v1099_v51 = vpop.f32.mrf.mxu3  ;;  %v1045_v57 = vadd.f32 %v2327_v50, %v1044_v42  ;;  %v1081_v62 = vadd.f32 %v1080_v41, %v1062_v56 }
  0xf1   : > { %v1064_v63 = vadd.f32 %v1063_v43, %v1045_v57  ;;  %v1100_v1 = vadd.f32 %v1099_v51, %v1081_v62  ;;  %v2202_v51 = vld [vmem:[#allocation10 + $0x30] sm:$0xff]  ;;  %v2200_v57 = vld [vmem:[#allocation10 + $0x20] sm:$0xff] }
  0xf2   : > { %1427 = vmatpush.bf16.msra.mxu1 %v2202_v51 }
  0xf6   : > { %v1082_v46 = vpop.f32.mrf.mxu2  ;;  %v1047_v47 = vpop.f32.mrf.mxu0 }
  0xf7   : > { %v1066_v48 = vpop.f32.mrf.mxu1  ;;  %v1101_v61 = vpop.f32.mrf.mxu3  ;;  %v1083_v0 = vadd.f32 %v1082_v46, %v1064_v63  ;;  %v1048_v9 = vadd.f32 %v2327_v50, %v1047_v47  ;;  %v2190_v46 = vld [vmem:[#allocation8 + $0x10] sm:$0xff]  ;;  %v2189_v47 = vld [vmem:[#allocation8 + $0x8] sm:$0xff] }
  0xf8   : > { %1338 = vmatpush.bf16.msra.mxu0 %v2190_v46  ;;  %2218 = vmatpush.bf16.msra.mxu3 %v2190_v46  ;;  %v2331_v46 = vld [vmem:[%s2889_s10] ss:$0 sm:$0xff] }
  0xf9   : > { %v1102_v4 = vadd.f32 %v1101_v61, %v1083_v0  ;;  %v1067_v14 = vadd.f32 %v1066_v48, %v1048_v9  ;;  %v2188_v48 = vld [vmem:[#allocation8] sm:$0xff] }
  0xfa   : > { %v2329_v9 = vld [vmem:[%s2885_s6] ss:$0 sm:$0xff] }
  0xfc   : > { %1339 = vmatpush.bf16.msra.mxu0 %v2189_v47  ;;  %2219 = vmatpush.bf16.msra.mxu3 %v2189_v47 }
  0xfe   : > { %v1085_v52 = vpop.f32.mrf.mxu2  ;;  %v1049_v53 = vpop.f32.mrf.mxu0 }
  0xff   : > { %v1068_v54 = vpop.f32.mrf.mxu1  ;;  %v1104_v11 = vpop.f32.mrf.mxu3  ;;  %v1050_v15 = vadd.f32 %v2327_v50, %v1049_v53  ;;  %v1086_v22 = vadd.f32 %v1085_v52, %v1067_v14  ;;  %v2328_v52 = vld [vmem:[%s2883_s4] ss:$0 sm:$0xff]  ;;  %v2201_v53 = vld [vmem:[#allocation10 + $0x28] sm:$0xff] }
 0x100   : > { %1340 = vmatpush.bf16.msra.mxu0 %v2188_v48  ;;  %2220 = vmatpush.bf16.msra.mxu3 %v2188_v48 }
 0x101   : > { %v1069_v23 = vadd.f32 %v1068_v54, %v1050_v15  ;;  %v1105_v30 = vadd.f32 %v1104_v11, %v1086_v22  ;;  %1428 = vmatpush.bf16.msra.mxu1 %v2201_v53 }
 0x105   : > { %1429 = vmatpush.bf16.msra.mxu1 %v2200_v57 }
 0x106   : > { %v1087_v58 = vpop.f32.mrf.mxu2  ;;  %v1118_v59 = vpop.f32.mrf.mxu0 }
 0x107   : > { %v1137_v60 = vpop.f32.mrf.mxu1  ;;  %v1119_v5 = vadd.f32 %v1118_v59, %v1100_v1  ;;  %v1088_v27 = vadd.f32 %v1087_v58, %v1069_v23  ;;  %v1106_v29 = vpop.f32.mrf.mxu3 }
 0x109   : > { %v1138_v12 = vadd.f32 %v1137_v60, %v1119_v5  ;;  %v1107_v32 = vadd.f32 %v1106_v29, %v1088_v27  ;;  %v2198_v5 = vld [vmem:[#allocation10 + $0x10] sm:$0xff]  ;;  %v2207_v27 = vld [vmem:[#allocation11 + $0x18] sm:$0xff]  ;;  %v2205_v29 = vld [vmem:[#allocation11 + $0x8] sm:$0xff] }
 0x10e   : > { %v1156_v3 = vpop.f32.mrf.mxu2  ;;  %v1120_v6 = vpop.f32.mrf.mxu0 }
 0x10f   : > { %v1139_v8 = vpop.f32.mrf.mxu1  ;;  %v1121_v10 = vadd.f32 %v1120_v6, %v1102_v4  ;;  %v1157_v16 = vadd.f32 %v1156_v3, %v1138_v12  ;;  %v2199_v4 = vld [vmem:[#allocation10 + $0x18] sm:$0xff]  ;;  %v2197_v6 = vld [vmem:[#allocation10 + $0x8] sm:$0xff]  ;;  %v2210_v12 = vld [vmem:[#allocation11 + $0x30] sm:$0xff] }
 0x110   : > { %1430 = vmatpush.bf16.msra.mxu1 %v2199_v4 }
 0x111   : > { %v1140_v17 = vadd.f32 %v1139_v8, %v1121_v10  ;;  %v1166_v24 = vmax.f32 %v1157_v16, 0.0  ;;  %v2211_v10 = vld [vmem:[#allocation11 + $0x38] sm:$0xff] }
 0x112   : > { %1519 = vmatpush.bf16.msra.mxu2 %v2211_v10 }
 0x114   : > { %1431 = vmatpush.bf16.msra.mxu1 %v2198_v5 }
 0x116   : > { %v1158_v18 = vpop.f32.mrf.mxu2  ;;  %v1123_v20 = vpop.f32.mrf.mxu0  ;;  %1520 = vmatpush.bf16.msra.mxu2 %v2210_v12 }
 0x117   : > { %v1159_v19 = vadd.f32 %v1158_v18, %v1140_v17  ;;  %v1142_v26 = vpop.f32.mrf.mxu1  ;;  %v1124_v33 = vadd.f32 %v1123_v20, %v1105_v30  ;;  %v2209_v17 = vld [vmem:[#allocation11 + $0x28] sm:$0xff]  ;;  %v2204_v30 = vld [vmem:[#allocation11] sm:$0xff] }
 0x118   : > { %1432 = vmatpush.bf16.msra.mxu1 %v2197_v6 }
 0x119   : > { %v1167_v25 = vmax.f32 %v1159_v19, 0.0  ;;  %v1143_v36 = vadd.f32 %v1142_v26, %v1124_v33  ;;  %v2208_v19 = vld [vmem:[#allocation11 + $0x20] sm:$0xff] }
 0x11a   : > { %1521 = vmatpush.bf16.msra.mxu2 %v2209_v17 }
 0x11b   : > { %v1170_v28 = vpack.c.bf16 %v1167_v25, %v1166_v24 }
 0x11c   : > { %1433 = vmatpush.bf16.msra.mxu1 %v2196_v7 }
 0x11d   : > { %1248 = vmatmul.bf16.vlgmr.msrb.gmra.mxu3 %v1170_v28  ;;  %v2206_v28 = vld [vmem:[#allocation11 + $0x10] sm:$0xff] }
 0x11e   : > { %v1161_v31 = vpop.f32.mrf.mxu2  ;;  %v1125_v34 = vpop.f32.mrf.mxu0  ;;  %1522 = vmatpush.bf16.msra.mxu2 %v2208_v19 }
 0x11f   : > { %v1126_v35 = vadd.f32 %v1125_v34, %v1107_v32  ;;  %v1144_v37 = vpop.f32.mrf.mxu1  ;;  %v1162_v38 = vadd.f32 %v1161_v31, %v1143_v36  ;;  %v2330_v32 = vld [vmem:[%s2887_s8] ss:$0 sm:$0xff] }
 0x121   : > { %v1145_v39 = vadd.f32 %v1144_v37, %v1126_v35  ;;  %v1168_v42 = vmax.f32 %v1162_v38, 0.0 }
 0x122   : > { %1523 = vmatpush.bf16.msra.mxu2 %v2207_v27 }
 0x126   : > { %v1163_v40 = vpop.f32.mrf.mxu2  ;;  %1524 = vmatpush.bf16.msra.mxu2 %v2206_v28 }
 0x127   : > { %v1164_v41 = vadd.f32 %v1163_v40, %v1145_v39 }
 0x129   : > { %v1169_v43 = vmax.f32 %v1164_v41, 0.0 }
 0x12a   : > { %1525 = vmatpush.bf16.msra.mxu2 %v2205_v29 }
 0x12b   : > { %v1171_v44 = vpack.c.bf16 %v1169_v43, %v1168_v42 }
 0x12d   : > { %1253 = vmatmul.bf16.gmra.mxu3 %v1171_v44 }
 0x12e   : > { %1526 = vmatpush.bf16.msra.mxu2 %v2204_v30 }
 0x1a0   : > { %v1249_v50 = vpop.f32.mrf.mxu3 }
 0x1a1   : > { %v1250_v54 = vadd.f32 %v2328_v52, %v1249_v50 }
 0x1a3   : > { %v1259_v58 = vmax.f32 %v1250_v54, 0.0 }
 0x1a8   : > { %v1251_v55 = vpop.f32.mrf.mxu3 }
 0x1a9   : > { %v1252_v56 = vadd.f32 %v2328_v52, %v1251_v55 }
 0x1ab   : > { %v1260_v59 = vmax.f32 %v1252_v56, 0.0 }
 0x1ad   : > { %v1263_v60 = vpack.c.bf16 %v1260_v59, %v1259_v58 }
 0x1af   : > { %1341 = vmatmul.bf16.vlgmr.msra.gmra.mxu0 %v1263_v60 }
 0x1b0   : > { %v1254_v61 = vpop.f32.mrf.mxu3 }
 0x1b1   : > { %v1255_v62 = vadd.f32 %v2328_v52, %v1254_v61 }
 0x1b3   : > { %v1261_v1 = vmax.f32 %v1255_v62, 0.0 }
 0x1b8   : > { %v1256_v63 = vpop.f32.mrf.mxu3 }
 0x1b9   : > { %v1257_v0 = vadd.f32 %v2328_v52, %v1256_v63 }
 0x1bb   : > { %v1262_v2 = vmax.f32 %v1257_v0, 0.0 }
 0x1bd   : > { %v1264_v3 = vpack.c.bf16 %v1262_v2, %v1261_v1 }
 0x1bf   : > { %1346 = vmatmul.bf16.vlgmr.msra.gmra.mxu3 %v1264_v3 }
 0x22c   : > { %v1342_v8 = vpop.f32.mrf.mxu0 }
 0x22d   : > { %v1343_v11 = vadd.f32 %v2329_v9, %v1342_v8 }
 0x22f   : > { %v1352_v15 = vmax.f32 %v1343_v11, 0.0 }
 0x234   : > { %v1344_v13 = vpop.f32.mrf.mxu0 }
 0x235   : > { %v1345_v14 = vadd.f32 %v2329_v9, %v1344_v13 }
 0x237   : > { %v1353_v16 = vmax.f32 %v1345_v14, 0.0 }
 0x239   : > { %v1356_v18 = vpack.c.bf16 %v1353_v16, %v1352_v15 }
 0x23b   : > { %1434 = vmatmul.bf16.vlgmr.msra.gmra.mxu1 %v1356_v18 }
 0x242   : > { %v1347_v20 = vpop.f32.mrf.mxu3 }
 0x243   : > { %v1348_v21 = vadd.f32 %v2329_v9, %v1347_v20 }
 0x245   : > { %v1354_v24 = vmax.f32 %v1348_v21, 0.0 }
 0x24a   : > { %v1349_v22 = vpop.f32.mrf.mxu3 }
 0x24b   : > { %v1350_v23 = vadd.f32 %v2329_v9, %v1349_v22 }
 0x24d   : > { %v1355_v25 = vmax.f32 %v1350_v23, 0.0 }
 0x24f   : > { %v1357_v26 = vpack.c.bf16 %v1355_v25, %v1354_v24 }
 0x251   : > { %1439 = vmatmul.bf16.gmra.mxu1 %v1357_v26 }
 0x2b8   : > { %v1435_v31 = vpop.f32.mrf.mxu1 }
 0x2b9   : > { %v1436_v33 = vadd.f32 %v2330_v32, %v1435_v31 }
 0x2bb   : > { %v1445_v36 = vmax.f32 %v1436_v33, 0.0 }
 0x2c0   : > { %v1437_v34 = vpop.f32.mrf.mxu1 }
 0x2c1   : > { %v1438_v35 = vadd.f32 %v2330_v32, %v1437_v34 }
 0x2c3   : > { %v1446_v37 = vmax.f32 %v1438_v35, 0.0 }
 0x2c5   : > { %v1449_v38 = vpack.c.bf16 %v1446_v37, %v1445_v36 }
 0x2c7   : > { %1527 = vmatmul.bf16.vlgmr.msra.gmra.mxu2 %v1449_v38 }
 0x2ce   : > { %v1440_v39 = vpop.f32.mrf.mxu1 }
 0x2cf   : > { %v1441_v40 = vadd.f32 %v2330_v32, %v1440_v39 }
 0x2d1   : > { %v1447_v43 = vmax.f32 %v1441_v40, 0.0 }
 0x2d6   : > { %v1442_v41 = vpop.f32.mrf.mxu1 }
 0x2d7   : > { %v1443_v42 = vadd.f32 %v2330_v32, %v1442_v41 }
 0x2d9   : > { %v1448_v44 = vmax.f32 %v1443_v42, 0.0 }
 0x2db   : > { %v1450_v45 = vpack.c.bf16 %v1448_v44, %v1447_v43 }
 0x2dd   : > { %1532 = vmatmul.bf16.gmra.mxu2 %v1450_v45 }
 0x34a   : > { %v1528_v47 = vpop.f32.mrf.mxu2 }
 0x34b   : > { %v1529_v48 = vadd.f32 %v2331_v46, %v1528_v47 }
 0x34d   : > { %1538 = vst [vmem:[%s490_s14] sm:$0xff] %v1529_v48 }
 0x352   : > { %v1530_v49 = vpop.f32.mrf.mxu2 }
 0x353   : > { %v1531_v50 = vadd.f32 %v2331_v46, %v1530_v49 }
 0x355   : > { %1539 = vst [vmem:[%s490_s14 + $0x8] sm:$0xff] %v1531_v50 }
 0x360   : > { %v1533_v51 = vpop.f32.mrf.mxu2 }
 0x361   : > { %v1534_v52 = vadd.f32 %v2331_v46, %v1533_v51 }
 0x363   : > { %1540 = vst [vmem:[%s490_s14 + $0x10] sm:$0xff] %v1534_v52 }
 0x368   : > { %v1535_v53 = vpop.f32.mrf.mxu2 }
 0x369   : > { %v1536_v54 = vadd.f32 %v2331_v46, %v1535_v53 }
 0x36b   : > { %1541 = vst [vmem:[%s490_s14 + $0x18] sm:$0xff] %v1536_v54 }
 0x36c   : > { %2539 = shalt.err (!%p2536_p9)
}
 0x36d   : > { %s2601_s19 = smov 128   ;;  %s2602_s13 = smov 8  }
 0x36e   : > { %2246 = dma.vmem_to_hbm [thread:$0]  (%p2749_p0), %s1556_s9, 512, %s1558_s3, %s1543_s25, %s2601_s19, %s2601_s19, %s2602_s13  }
 0x36f PF: > { %s1572_s15 = sand.u32 1, %s2578_s17   ;;  %p2913_p10 = scmp.ge.s32.totalorder %s2590_s20, 2 }
 0x370   : > { %s1573_s16 = scalar_lea.sflag [#allocation4], %s1572_s15 }
 0x371   : > { %p2269_p11 = pnand %p2913_p10, %p2755_p6 }
 0x373   : > { %p2270_p12 = pneg %p2269_p11 }
 0x375   : > { %2573 = dma.done.wait (%p2270_p12), %s1573_s16, 512  }
 0x376   : > { %2575 = vsyncadd (%p2270_p12), %s1573_s16, 4294966784  ;;  %s2914_s20 = sld [smem:[#allocation20_spill]]  ;;  %s2917_s17 = smov %s2582_s18 }
 0x377   : > { %s2915_s14 = sld [smem:[#allocation19_spill]] }
 0x378   : > { %s2916_s19 = sld [smem:[#allocation21_spill]] }
 0x37c   : > { %p27_p2 = scmp.ge.s32.totalorder %s2914_s20, 4  }
 0x37d   : > { %s2918_s18 = smov %s2915_s14 }
 0x37e   :  { %29 = sbr.rel (!%p27_p2) target bundleno = 14 (0xe), region = 129 }
 0x383   :  { %1579 = vsyncpa [#allocation3], 1 }
 0x384   :  { %1581 = vsyncpa [#allocation3 + $0x1], 1 }
 0x385   :  { %1582 = vsyncpa [#allocation6], 1 }
 0x386   :  { %1583 = vsyncpa [#allocation9], 1 }
 0x387   :  { %1584 = vsyncpa [#allocation12], 1 }
 0x388   :  { %1585 = vsyncpa [#allocation4], 1 }
 0x389   :  { %1587 = vsyncpa [#allocation4 + $0x1], 1 }

</bundles_post_ra>
